<compile_context>
chip_gen: v7x
topology: tpu7x:2x2x1
jax: 0.10.0
libtpu: 0.0.40
codegen_flags: <defaults>
</compile_context>

<pallas_src>
import numpy as np
import jax
import jax.numpy as jnp
from jax.experimental import pallas as pl
from jax.experimental.pallas import tpu as pltpu

DEPTH = 107          # hardcoded sequence length in AE_CNN_1D (padding='same')
LATENT = 9
LANE = 128           # lane-padded activation width
NEG_INF = -1e30      # MaxPool1d pads with -inf; -1e30 is exact enough (and bf16-safe)


# -----------------------------------------------------------------------------
# Host-side structural matrices (float64, folded once, cast to bf16 at the end).
# -----------------------------------------------------------------------------
def conv_toeplitz(w, L_in, pad):
    """M such that (x @ M)[:, l] = sum_t x[:, l + t - pad] * w[t]  (stride 1)."""
    w = np.asarray(w, np.float64)
    k = w.shape[0]
    L_out = L_in + 2 * pad - (k - 1)
    i = np.arange(L_in)[:, None]
    l = np.arange(L_out)[None, :]
    t = i - l + pad
    valid = (t >= 0) & (t < k)
    return np.where(valid, w[np.clip(t, 0, k - 1)], 0.0)


def convT_toeplitz(w, L_in, pad):
    # ConvTranspose1d(stride=1, padding=p) == Conv1d(flip(w), padding=k-1-p)
    w = np.asarray(w, np.float64)
    return conv_toeplitz(w[::-1], L_in, w.shape[0] - 1 - pad)


def maxpool_select(L_in):
    """MaxPool1d(kernel=3, stride=2, padding=1) as 3 gather matrices + -inf pad bias."""
    L_out = 1 + (L_in - 1) // 2
    P = np.zeros((3, L_in, L_out), np.float64)
    Q = np.zeros((3, 1, L_out), np.float64)
    for j in range(3):
        for l in range(L_out):
            idx = 2 * l - 1 + j
            if 0 <= idx < L_in:
                P[j, idx, l] = 1.0
            else:
                Q[j, 0, l] = NEG_INF
    return P, Q


def upsample2_select(L_in):
    """nn.Upsample(scale_factor=2, mode='nearest') as a 0/1 selection matrix."""
    U = np.zeros((L_in, 2 * L_in), np.float64)
    for l in range(2 * L_in):
        U[l // 2, l] = 1.0
    return U


def upsample_size_select(L_in, L_out):
    """nn.Upsample(size=L_out, mode='nearest')."""
    U = np.zeros((L_in, L_out), np.float64)
    for l in range(L_out):
        U[min((l * L_in) // L_out, L_in - 1), l] = 1.0
    return U


def build_packed_operands(params):
    """Fold the whole network into 6 stage matrices packed in two bf16 buffers.

    W_enc : (3, 128, 384) bf16 — encoder stage s: Conv1d folded into the 3
            maxpool branch matrices (slabs at lane offsets 0/128/256).
    W_dec : (3, 128, 128) bf16 — decoder stages (latent linears folded into the
            first one, final Linear(107,107) folded into the last one).
    Biases live in row 127; a 1.0 at (127, slab_off+127) carries the constant
    lane through each stage (input lane 127 is set to 1.0 by the wrapper).
    Padded rows/cols are zero, so zero-valued padded lanes never propagate.
    """
    p = {k: np.asarray(v, np.float64) for k, v in params.items()}
    We = np.zeros((3, LANE, 3 * LANE), np.float64)
    Wd = np.zeros((3, LANE, LANE), np.float64)

    # ---- encoder stages: Conv1d folded into the 3 maxpool branch matrices ----
    enc = [(p['ew1'], p['eb1'], 107, 3),
           (p['ew2'], p['eb2'], 54, 3),
           (p['ew3'], p['eb3'], 27, 2)]
    for s, (w, b, L_in, pad) in enumerate(enc):
        M = conv_toeplitz(w, L_in, pad)           # (L_in, L_in)
        P, Q = maxpool_select(L_in)               # (3, L_in, L_out), (3, 1, L_out)
        L_out = P.shape[2]
        for j in range(3):
            off = j * LANE
            We[s, :L_in, off:off + L_out] = M @ P[j]
            We[s, LANE - 1, off:off + L_out] = float(b) * P[j].sum(axis=0) + Q[j, 0]
            We[s, LANE - 1, off + LANE - 1] = 1.0         # bias-carry lane

    # ---- decoder stage 0: Linear(14,9) ∘ Linear(9,14) ∘ ConvT(3,p1) ∘ Up(x2) ----
    A = p['elW'].T @ p['dlW'].T                           # (14, 14)
    a = p['elb'] @ p['dlW'].T + p['dlb']                  # (14,)
    D1 = convT_toeplitz(p['dw1'], 14, 1)
    U1 = upsample2_select(14)
    G1 = D1 @ U1                                          # (14, 28)
    Wd[0, :14, :28] = A @ G1
    Wd[0, LANE - 1, :28] = a @ G1 + float(p['db1']) * U1.sum(axis=0)
    Wd[0, LANE - 1, LANE - 1] = 1.0

    # ---- decoder stage 1: ConvT(3,p1) ∘ Upsample(x2) ----
    D2 = convT_toeplitz(p['dw2'], 28, 1)
    U2 = upsample2_select(28)
    Wd[1, :28, :56] = D2 @ U2
    Wd[1, LANE - 1, :56] = float(p['db2']) * U2.sum(axis=0)
    Wd[1, LANE - 1, LANE - 1] = 1.0

    # ---- decoder stage 2: ConvT(5,p2) ∘ Upsample(size=107) ∘ Linear(107,107) ----
    D3 = convT_toeplitz(p['dw3'], 56, 2)
    U3 = upsample_size_select(56, 107)
    Wf = p['fW'].T
    Wd[2, :56, :107] = D3 @ U3 @ Wf
    Wd[2, LANE - 1, :107] = (float(p['db3']) * U3.sum(axis=0)) @ Wf + p['fb']
    # no carry needed after the final stage (lanes >= 107 are sliced away)

    return jnp.asarray(We, jnp.bfloat16), jnp.asarray(Wd, jnp.bfloat16)


# -----------------------------------------------------------------------------
# Pallas kernel: whole encoder + decoder forward pass, 6 bf16 MXU matmuls.
# -----------------------------------------------------------------------------
def ae_cnn_1d_kernel(x_ref, we_ref, wd_ref, o_ref):
    def mm(a, w):
        # bf16 MXU matmul, f32 accumulation; elementwise stays f32 (v5e-friendly).
        return jnp.dot(a.astype(jnp.bfloat16), w, preferred_element_type=jnp.float32)

    h = x_ref[...]                                  # (TB, 128) f32, lane 127 == 1.0
    # ---------------- encoder: Conv1d -> MaxPool -> ReLU (bias in row 127) ----
    for s in range(3):                              # 107 -> 54 -> 27 -> 14 valid lanes
        y = mm(h, we_ref[s])                        # (TB, 384): 3 pool branches
        m = jnp.maximum(jnp.maximum(y[:, :LANE], y[:, LANE:2 * LANE]), y[:, 2 * LANE:])
        h = jnp.maximum(m, 0.0)
    # ---------------- latent + decoder ----------------------------------------
    h = jnp.maximum(mm(h, wd_ref[0]), 0.0)          # Lin(14,9)∘Lin(9,14)∘ConvT∘Up -> 28
    h = jnp.maximum(mm(h, wd_ref[1]), 0.0)          # ConvT∘Up                      -> 56
    h = mm(h, wd_ref[2])                            # ConvT∘Up(107)∘Linear(107,107) -> 107
    o_ref[...] = h                                  # lane-dense (TB,128) store; valid [0:107]


def ae_cnn_1d_forward(x, W_enc, W_dec, *, tile_b=1024):
    nb = x.shape[0]
    x = x.astype(jnp.float32)
    nb8 = -(-nb // 8) * 8                           # batch rounded up to sublane multiple
    tb = max(8, (int(min(tile_b, nb8)) // 8) * 8)
    if nb8 >= 16 and nb8 // tb < 2:
        # ensure >= 2 grid steps so the "parallel" axis shards across both v7x TCs
        tb = max(8, (-(-(nb8 // 2)) // 8) * 8 * 1)
        tb = max(8, -(-(nb8 // 2) // 8) * 8)
    nb_pad = -(-nb8 // tb) * tb
    # TODO(synk): for very large batches, accept/return the lane-padded (.,128)
    # layout directly to avoid this extra HBM pad/slice pass outside the kernel.
    xp = jnp.zeros((nb_pad, LANE), jnp.float32)
    xp = xp.at[:nb, :DEPTH].set(x)
    xp = xp.at[:, LANE - 1].set(1.0)                # bias-carry lane
    out = pl.pallas_call(
        ae_cnn_1d_kernel,
        out_shape=jax.ShapeDtypeStruct((nb_pad, LANE), jnp.float32),
        grid_spec=pltpu.PrefetchScalarGridSpec(
            num_scalar_prefetch=0,
            grid=(nb_pad // tb,),
            in_specs=[
                pl.BlockSpec((tb, LANE), lambda i: (i, 0)),
                pl.BlockSpec((3, LANE, 3 * LANE), lambda i: (0, 0, 0)),
                pl.BlockSpec((3, LANE, LANE), lambda i: (0, 0, 0)),
            ],
            out_specs=pl.BlockSpec((tb, LANE), lambda i: (i, 0)),
        ),
        compiler_params=pltpu.CompilerParams(dimension_semantics=("parallel",)),
    )(xp, W_enc, W_dec)
    return out[:nb, :DEPTH]


# -----------------------------------------------------------------------------
# Deterministic parameter init (shapes follow the module's __init__).
# -----------------------------------------------------------------------------
def init_params(key):
    ks = iter(jax.random.split(key, 24))

    def u(shape, fan_in):
        s = 1.0 / np.sqrt(fan_in)
        return jax.random.uniform(next(ks), shape, jnp.float32, -s, s)

    return dict(
        ew1=u((7,), 7),  eb1=u((), 7),        # encoder Conv1d(1,1,7)
        ew2=u((7,), 7),  eb2=u((), 7),        # encoder Conv1d(1,1,7)
        ew3=u((5,), 5),  eb3=u((), 5),        # encoder Conv1d(1,1,5)
        elW=u((LATENT, 14), 14), elb=u((LATENT,), 14),      # Linear(14, 9)
        dlW=u((14, LATENT), LATENT), dlb=u((14,), LATENT),  # Linear(9, 14)
        dw1=u((3,), 3),  db1=u((), 3),        # decoder ConvTranspose1d(1,1,3)
        dw2=u((3,), 3),  db2=u((), 3),        # decoder ConvTranspose1d(1,1,3)
        dw3=u((5,), 5),  db3=u((), 5),        # decoder ConvTranspose1d(1,1,5)
        fW=u((DEPTH, DEPTH), DEPTH), fb=u((DEPTH,), DEPTH), # final nn.Linear(107,107)
    )


# -----------------------------------------------------------------------------
# Independent plain-JAX f32 reference (direct conv / pool / upsample).
# -----------------------------------------------------------------------------
def ref_forward(x, p):
    def conv1d(h, w, b, pad):
        k = w.shape[0]
        hp = jnp.pad(h, ((0, 0), (pad, pad)))
        L = h.shape[1] + 2 * pad - (k - 1)
        acc = jnp.zeros((h.shape[0], L), jnp.float32)
        for t in range(k):
            acc = acc + w[t] * hp[:, t:t + L]
        return acc + b

    def convT1d(h, w, b, pad):
        return conv1d(h, w[::-1], b, w.shape[0] - 1 - pad)

    def maxpool(h):
        Lo = 1 + (h.shape[1] - 1) // 2
        hp = jnp.pad(h, ((0, 0), (1, 1)), constant_values=NEG_INF)
        c = [hp[:, j::2][:, :Lo] for j in range(3)]
        return jnp.maximum(jnp.maximum(c[0], c[1]), c[2])

    relu = jax.nn.relu
    h = conv1d(x, p['ew1'], p['eb1'], 3); h = relu(maxpool(h))
    h = conv1d(h, p['ew2'], p['eb2'], 3); h = relu(maxpool(h))
    h = conv1d(h, p['ew3'], p['eb3'], 2); h = relu(maxpool(h))
    z = h @ p['elW'].T + p['elb']
    h = z @ p['dlW'].T + p['dlb']
    h = convT1d(h, p['dw1'], p['db1'], 1); h = relu(jnp.repeat(h, 2, axis=1))
    h = convT1d(h, p['dw2'], p['db2'], 1); h = relu(jnp.repeat(h, 2, axis=1))
    h = convT1d(h, p['dw3'], p['db3'], 2)
    idx = np.minimum((np.arange(DEPTH) * h.shape[1]) // DEPTH, h.shape[1] - 1)
    h = h[:, idx]
    return h @ p['fW'].T + p['fb']


if __name__ == "__main__":
    root = jax.random.PRNGKey(0)
    k_params, k_x1, k_x2 = jax.random.split(root, 3)
    params = init_params(k_params)
    W_enc, W_dec = build_packed_operands(params)

    # small batch (single 8-row tile, grid=1)
    x = jax.random.normal(k_x1, (4, DEPTH), jnp.float32)
    out = jax.block_until_ready(ae_cnn_1d_forward(x, W_enc, W_dec))
    assert out.shape == (4, DEPTH)
    np.testing.assert_allclose(np.asarray(out), np.asarray(ref_forward(x, params)),
                               rtol=3e-2, atol=3e-2)   # bf16 matmul tolerance

    # larger batch exercising the batch grid (grid > 1, parallel axis)
    x2 = jax.random.normal(k_x2, (300, DEPTH), jnp.float32)
    out2 = jax.block_until_ready(ae_cnn_1d_forward(x2, W_enc, W_dec, tile_b=128))
    assert out2.shape == (300, DEPTH)
    np.testing.assert_allclose(np.asarray(out2), np.asarray(ref_forward(x2, params)),
                               rtol=3e-2, atol=3e-2)

    print("KERNEL_OK")
</pallas_src>

<mosaic_0001>
module attributes {stable_mosaic.version = 11 : i64} {
  func.func @ae_cnn_1d_kernel(%arg0: i32, %arg1: memref<8x128xf32, #tpu.memory_space<vmem>>, %arg2: memref<3x128x384xbf16, #tpu.memory_space<vmem>>, %arg3: memref<3x128x128xbf16, #tpu.memory_space<vmem>>, %arg4: memref<8x128xf32, #tpu.memory_space<vmem>>) attributes {dimension_semantics = [#tpu.dimension_semantics<parallel>], iteration_bounds = array<i64: 1>, scalar_prefetch = 0 : i64, scratch_operands = 0 : i64, tpu.core_type = #tpu.core_type<tc>, window_params = [{transform_indices = @transform_0, window_bounds = array<i64: 8, 128>}, {pipeline_mode = #tpu.pipeline_mode<synchronous>, transform_indices = @transform_1, window_bounds = array<i64: 3, 128, 384>}, {pipeline_mode = #tpu.pipeline_mode<synchronous>, transform_indices = @transform_2, window_bounds = array<i64: 3, 128, 128>}, {transform_indices = @transform_3, window_bounds = array<i64: 8, 128>}]} {
    %c0 = arith.constant 0 : index
    %c0_0 = arith.constant 0 : index
    %0 = vector.load %arg1[%c0, %c0_0] : memref<8x128xf32, #tpu.memory_space<vmem>>, vector<8x128xf32>
    %c0_1 = arith.constant 0 : index
    %c0_2 = arith.constant 0 : index
    %c0_3 = arith.constant 0 : index
    %1 = vector.load %arg2[%c0_1, %c0_2, %c0_3] : memref<3x128x384xbf16, #tpu.memory_space<vmem>>, vector<1x128x384xbf16>
    %2 = vector.shape_cast %1 : vector<1x128x384xbf16> to vector<128x384xbf16>
    %3 = arith.truncf %0 : vector<8x128xf32> to vector<8x128xbf16>
    %cst = arith.constant dense<0.000000e+00> : vector<8x384xf32>
    %4 = tpu.matmul %3, %2, %cst {dimension_numbers = #tpu.dot_dimension_numbers<[1], [0], [0], [1], [0, 0, 1, 1], [], []>} : vector<8x128xbf16>, vector<128x384xbf16>, vector<8x384xf32> -> vector<8x384xf32>
    %5 = vector.extract_strided_slice %4 {offsets = [0, 0], sizes = [8, 128], strides = [1, 1]} : vector<8x384xf32> to vector<8x128xf32>
    %6 = vector.extract_strided_slice %4 {offsets = [0, 128], sizes = [8, 128], strides = [1, 1]} : vector<8x384xf32> to vector<8x128xf32>
    %7 = arith.maximumf %5, %6 : vector<8x128xf32>
    %8 = vector.extract_strided_slice %4 {offsets = [0, 256], sizes = [8, 128], strides = [1, 1]} : vector<8x384xf32> to vector<8x128xf32>
    %9 = arith.maximumf %7, %8 : vector<8x128xf32>
    %cst_4 = arith.constant 0.000000e+00 : f32
    %10 = vector.broadcast %cst_4 : f32 to vector<8x128xf32>
    %11 = arith.maximumf %9, %10 : vector<8x128xf32>
    %c1 = arith.constant 1 : index
    %c0_5 = arith.constant 0 : index
    %c0_6 = arith.constant 0 : index
    %12 = vector.load %arg2[%c1, %c0_5, %c0_6] : memref<3x128x384xbf16, #tpu.memory_space<vmem>>, vector<1x128x384xbf16>
    %13 = vector.shape_cast %12 : vector<1x128x384xbf16> to vector<128x384xbf16>
    %14 = arith.truncf %11 : vector<8x128xf32> to vector<8x128xbf16>
    %cst_7 = arith.constant dense<0.000000e+00> : vector<8x384xf32>
    %15 = tpu.matmul %14, %13, %cst_7 {dimension_numbers = #tpu.dot_dimension_numbers<[1], [0], [0], [1], [0, 0, 1, 1], [], []>} : vector<8x128xbf16>, vector<128x384xbf16>, vector<8x384xf32> -> vector<8x384xf32>
    %16 = vector.extract_strided_slice %15 {offsets = [0, 0], sizes = [8, 128], strides = [1, 1]} : vector<8x384xf32> to vector<8x128xf32>
    %17 = vector.extract_strided_slice %15 {offsets = [0, 128], sizes = [8, 128], strides = [1, 1]} : vector<8x384xf32> to vector<8x128xf32>
    %18 = arith.maximumf %16, %17 : vector<8x128xf32>
    %19 = vector.extract_strided_slice %15 {offsets = [0, 256], sizes = [8, 128], strides = [1, 1]} : vector<8x384xf32> to vector<8x128xf32>
    %20 = arith.maximumf %18, %19 : vector<8x128xf32>
    %cst_8 = arith.constant 0.000000e+00 : f32
    %21 = vector.broadcast %cst_8 : f32 to vector<8x128xf32>
    %22 = arith.maximumf %20, %21 : vector<8x128xf32>
    %c2 = arith.constant 2 : index
    %c0_9 = arith.constant 0 : index
    %c0_10 = arith.constant 0 : index
    %23 = vector.load %arg2[%c2, %c0_9, %c0_10] : memref<3x128x384xbf16, #tpu.memory_space<vmem>>, vector<1x128x384xbf16>
    %24 = vector.shape_cast %23 : vector<1x128x384xbf16> to vector<128x384xbf16>
    %25 = arith.truncf %22 : vector<8x128xf32> to vector<8x128xbf16>
    %cst_11 = arith.constant dense<0.000000e+00> : vector<8x384xf32>
    %26 = tpu.matmul %25, %24, %cst_11 {dimension_numbers = #tpu.dot_dimension_numbers<[1], [0], [0], [1], [0, 0, 1, 1], [], []>} : vector<8x128xbf16>, vector<128x384xbf16>, vector<8x384xf32> -> vector<8x384xf32>
    %27 = vector.extract_strided_slice %26 {offsets = [0, 0], sizes = [8, 128], strides = [1, 1]} : vector<8x384xf32> to vector<8x128xf32>
    %28 = vector.extract_strided_slice %26 {offsets = [0, 128], sizes = [8, 128], strides = [1, 1]} : vector<8x384xf32> to vector<8x128xf32>
    %29 = arith.maximumf %27, %28 : vector<8x128xf32>
    %30 = vector.extract_strided_slice %26 {offsets = [0, 256], sizes = [8, 128], strides = [1, 1]} : vector<8x384xf32> to vector<8x128xf32>
    %31 = arith.maximumf %29, %30 : vector<8x128xf32>
    %cst_12 = arith.constant 0.000000e+00 : f32
    %32 = vector.broadcast %cst_12 : f32 to vector<8x128xf32>
    %33 = arith.maximumf %31, %32 : vector<8x128xf32>
    %c0_13 = arith.constant 0 : index
    %c0_14 = arith.constant 0 : index
    %c0_15 = arith.constant 0 : index
    %34 = vector.load %arg3[%c0_13, %c0_14, %c0_15] : memref<3x128x128xbf16, #tpu.memory_space<vmem>>, vector<1x128x128xbf16>
    %35 = vector.shape_cast %34 : vector<1x128x128xbf16> to vector<128x128xbf16>
    %36 = arith.truncf %33 : vector<8x128xf32> to vector<8x128xbf16>
    %cst_16 = arith.constant dense<0.000000e+00> : vector<8x128xf32>
    %37 = tpu.matmul %36, %35, %cst_16 {dimension_numbers = #tpu.dot_dimension_numbers<[1], [0], [0], [1], [0, 0, 1, 1], [], []>} : vector<8x128xbf16>, vector<128x128xbf16>, vector<8x128xf32> -> vector<8x128xf32>
    %cst_17 = arith.constant 0.000000e+00 : f32
    %38 = vector.broadcast %cst_17 : f32 to vector<8x128xf32>
    %39 = arith.maximumf %37, %38 : vector<8x128xf32>
    %c1_18 = arith.constant 1 : index
    %c0_19 = arith.constant 0 : index
    %c0_20 = arith.constant 0 : index
    %40 = vector.load %arg3[%c1_18, %c0_19, %c0_20] : memref<3x128x128xbf16, #tpu.memory_space<vmem>>, vector<1x128x128xbf16>
    %41 = vector.shape_cast %40 : vector<1x128x128xbf16> to vector<128x128xbf16>
    %42 = arith.truncf %39 : vector<8x128xf32> to vector<8x128xbf16>
    %cst_21 = arith.constant dense<0.000000e+00> : vector<8x128xf32>
    %43 = tpu.matmul %42, %41, %cst_21 {dimension_numbers = #tpu.dot_dimension_numbers<[1], [0], [0], [1], [0, 0, 1, 1], [], []>} : vector<8x128xbf16>, vector<128x128xbf16>, vector<8x128xf32> -> vector<8x128xf32>
    %cst_22 = arith.constant 0.000000e+00 : f32
    %44 = vector.broadcast %cst_22 : f32 to vector<8x128xf32>
    %45 = arith.maximumf %43, %44 : vector<8x128xf32>
    %c2_23 = arith.constant 2 : index
    %c0_24 = arith.constant 0 : index
    %c0_25 = arith.constant 0 : index
    %46 = vector.load %arg3[%c2_23, %c0_24, %c0_25] : memref<3x128x128xbf16, #tpu.memory_space<vmem>>, vector<1x128x128xbf16>
    %47 = vector.shape_cast %46 : vector<1x128x128xbf16> to vector<128x128xbf16>
    %48 = arith.truncf %45 : vector<8x128xf32> to vector<8x128xbf16>
    %cst_26 = arith.constant dense<0.000000e+00> : vector<8x128xf32>
    %49 = tpu.matmul %48, %47, %cst_26 {dimension_numbers = #tpu.dot_dimension_numbers<[1], [0], [0], [1], [0, 0, 1, 1], [], []>} : vector<8x128xbf16>, vector<128x128xbf16>, vector<8x128xf32> -> vector<8x128xf32>
    %c0_27 = arith.constant 0 : index
    %c0_28 = arith.constant 0 : index
    %50 = vector.load %arg4[%c0_27, %c0_28] : memref<8x128xf32, #tpu.memory_space<vmem>>, vector<8x128xf32>
    tpu.vector_store %arg4[%c0_27, %c0_28], %49 {strides = array<i32>} : memref<8x128xf32, #tpu.memory_space<vmem>>, vector<8x128xf32>,
    return
  }
  func.func @transform_0(%arg0: i32) -> (i32, i32) {
    %c0_i32 = arith.constant 0 : i32
    %c0_i32_0 = arith.constant 0 : i32
    return %arg0, %c0_i32 : i32, i32
  }
  func.func @transform_1(%arg0: i32) -> (i32, i32, i32) {
    %c0_i32 = arith.constant 0 : i32
    %c0_i32_0 = arith.constant 0 : i32
    %c0_i32_1 = arith.constant 0 : i32
    %c0_i32_2 = arith.constant 0 : i32
    return %c0_i32, %c0_i32_0, %c0_i32_1 : i32, i32, i32
  }
  func.func @transform_2(%arg0: i32) -> (i32, i32, i32) {
    %c0_i32 = arith.constant 0 : i32
    %c0_i32_0 = arith.constant 0 : i32
    %c0_i32_1 = arith.constant 0 : i32
    %c0_i32_2 = arith.constant 0 : i32
    return %c0_i32, %c0_i32_0, %c0_i32_1 : i32, i32, i32
  }
  func.func @transform_3(%arg0: i32) -> (i32, i32) {
    %c0_i32 = arith.constant 0 : i32
    %c0_i32_0 = arith.constant 0 : i32
    return %arg0, %c0_i32 : i32, i32
  }
}

</mosaic_0001>

<bundles_post_ra>
// kernel: tpu_custom_call.1
= control target key start
LH: loop header
LB: loop body
LE: loop exit
PB: predicated region body
PF: predicated region fallthrough
CT: control target
= control target key end

     0   :  { %8 = vsyncpa [#allocation3], 0  ;;  %s1766_s0 = inlined_call_operand.hbm [shape: f32[8,128], index: 0, kind: input, shape index: {}]   ;;  %s1767_s1 = inlined_call_operand.hbm [shape: bf16[3,128,384], index: 1, kind: input, shape index: {}]   ;;  %s1768_s2 = inlined_call_operand.hbm [shape: bf16[3,128,128], index: 2, kind: input, shape index: {}]   ;;  %s1769_s3 = inlined_call_operand.hbm [shape: f32[8,128], index: 3, kind: output, shape index: {}]  }
   0x1   :  { %9 = vsyncpa [#allocation6], 0 }
   0x2   :  { %10 = vsyncpa [#allocation4], 0  ;;  %s1624_s12 = smov [#allocation5]   ;;  %s1530_s16 = scalar_lea.hbm %s1767_s1, 9216 }
   0x3   :  { %s26_s13 = sshll.u32 %s1624_s12, 4  ;;  %p1531_p0 = scmp.ne.s32.totalorder %s1767_s1, %s1530_s16  ;;  %s27_s13 = int_to_ptr.vmem [resolvable:$true] %s26_s13 }
   0x4   :  { %p1534_p1 = scmp.lt.u32.totalorder %s1530_s16, %s1767_s1 }
   0x6   :  { %p1536_p2 = pnand %p1534_p1, %p1531_p0 }
   0x8   :  { %1539 = shalt.err (!%p1536_p2)
}
   0x9   :  { %s1540_s21 = scalar_lea.vmem %s27_s13, 9216  ;;  %p1545_p4 = scmp.lt.s32.totalorder %s27_s13, %s27_s13 }
   0xa   :  { %p1541_p3 = scmp.ne.s32.totalorder %s27_s13, %s1540_s21  ;;  %p1546_p5 = scmp.lt.s32.totalorder %s1540_s21, %s1540_s21 }
   0xc   :  { %p1547_p6 = por %p1546_p5, %p1545_p4 }
   0xe   :  { %p1548_p7 = pnand %p1547_p6, %p1541_p3 }
  0x10   :  { %1551 = shalt.err (!%p1548_p7)
}
  0x11   :  { %s1625_s22 = smov 192   ;;  %s1626_s23 = smov 12  }
  0x12   :  { %32 = dma.hbm_to_vmem [thread:$0]  %s1767_s1, 9216, %s27_s13, [#allocation6], %s1625_s22, %s1625_s22, %s1626_s23  }
  0x13   :  { %s1627_s26 = smov [#allocation2]   ;;  %s1628_s28 = smov [#allocation7]  }
  0x14   :  { %s17_s27 = sshll.u32 %s1627_s26, 4  ;;  %s38_s29 = sshll.u32 %s1628_s28, 4  ;;  %s18_s27 = int_to_ptr.vmem [resolvable:$true] %s17_s27  ;;  %s39_s29 = int_to_ptr.vmem [resolvable:$true] %s38_s29 }
  0x15   :  { %s1552_s5 = scalar_lea.hbm %s1766_s0, 128 }
  0x16   :  { %p1553_p8 = scmp.ne.s32.totalorder %s1766_s0, %s1552_s5  ;;  %p1556_p9 = scmp.lt.u32.totalorder %s1552_s5, %s1766_s0 }
  0x18   :  { %p1558_p10 = pnand %p1556_p9, %p1553_p8 }
  0x1a   :  { %1561 = shalt.err (!%p1558_p10)
}
  0x1b   :  { %s1562_s1 = scalar_lea.vmem %s18_s27, 128  ;;  %p1567_p12 = scmp.lt.s32.totalorder %s18_s27, %s18_s27 }
  0x1c   :  { %p1563_p11 = scmp.ne.s32.totalorder %s18_s27, %s1562_s1  ;;  %p1568_p13 = scmp.lt.s32.totalorder %s1562_s1, %s1562_s1 }
  0x1e   :  { %p1569_p0 = por %p1568_p13, %p1567_p12 }
  0x20   :  { %p1570_p1 = pnand %p1569_p0, %p1563_p11 }
  0x22   :  { %1573 = shalt.err (!%p1570_p1)
}
  0x23   :  { %20 = dma.hbm_to_vmem [thread:$0]  %s1766_s0, 128, %s18_s27, [#allocation3]  }
  0x24   :  { %s1574_s14 = scalar_lea.hbm %s1768_s2, 3072 }
  0x25   :  { %p1575_p2 = scmp.ne.s32.totalorder %s1768_s2, %s1574_s14  ;;  %p1578_p3 = scmp.lt.u32.totalorder %s1574_s14, %s1768_s2 }
  0x27   :  { %p1580_p4 = pnand %p1578_p3, %p1575_p2 }
  0x29   :  { %1583 = shalt.err (!%p1580_p4)
}
  0x2a   :  { %s1584_s19 = scalar_lea.vmem %s39_s29, 3072  ;;  %p1589_p6 = scmp.lt.s32.totalorder %s39_s29, %s39_s29 }
  0x2b   :  { %p1585_p5 = scmp.ne.s32.totalorder %s39_s29, %s1584_s19  ;;  %p1590_p7 = scmp.lt.s32.totalorder %s1584_s19, %s1584_s19 }
  0x2d   :  { %p1591_p8 = por %p1590_p7, %p1589_p6 }
  0x2f   :  { %p1592_p9 = pnand %p1591_p8, %p1585_p5 }
  0x31   :  { %1595 = shalt.err (!%p1592_p9)
}
  0x32   :  { %s1629_s0 = smov 64   ;;  %s1630_s20 = smov 4  }
  0x33   :  { %44 = dma.hbm_to_vmem [thread:$0]  %s1768_s2, 3072, %s39_s29, [#allocation6], %s1629_s0, %s1629_s0, %s1630_s20  }
  0x34   :  { %1618 = dma.done.wait [#allocation3], 128  }
  0x35   :  { %1619 = vsyncadd [#allocation3], 4294967168 }
  0x36   :  { %1620 = dma.done.wait [#allocation6], 12288  }
  0x37   :  { %1621 = vsyncadd [#allocation6], 4294955008  ;;  %v1631_v0 = vmov 0.0   ;;  %v1632_v1 = vmov 0   ;;  %vm1633_vm0 = vmmov 0   ;;  %v55_v26 = vld [vmem:[#allocation2] sm:$0xff] }
  0x38   :  { %1279 = vmatprep.subr.bf16.mxu1 %v1631_v0  ;;  %249 = vmatprep.mubr.bf16.mxu0 %v1632_v1  ;;  %v1410_v2 = vld [vmem:[#allocation5 + $0x4] ss:$12 sps:$4 sm:$0xff]   ;;  %v1412_v3 = vld [vmem:[#allocation5] ss:$12 sps:$4 sm:$0xff]   ;;  %v1413_v4 = vld [vmem:[#allocation5 + $0x8] ss:$12 sps:$4 sm:$0xff]   ;;  %v88_v28 = vpack.c.bf16 %v55_v26, %v55_v26 }
  0x39   :  { %1295 = vmatprep.mubr.msk.bf16.mxu1 %vm1633_vm0, %v1631_v0  ;;  %217 = vmatprep.subr.bf16.mxu0 %v1410_v2  ;;  %v1414_v5 = vld [vmem:[#allocation5 + $0x1c] ss:$12 sps:$4 sm:$0xff]   ;;  %v1416_v6 = vld [vmem:[#allocation5 + $0x18] ss:$12 sps:$4 sm:$0xff]   ;;  %v1417_v7 = vld [vmem:[#allocation5 + $0x20] ss:$12 sps:$4 sm:$0xff]  }
  0x3a   :  { %218 = vmatpush1.bf16.msra.mxu0 %v1412_v3  ;;  %1280 = vmatpush3.bf16.msra.mxu1 %v1413_v4  ;;  %v1418_v8 = vld [vmem:[#allocation5 + $0x34] ss:$12 sps:$4 sm:$0xff]   ;;  %v1420_v9 = vld [vmem:[#allocation5 + $0x30] ss:$12 sps:$4 sm:$0xff]   ;;  %v1421_v10 = vld [vmem:[#allocation5 + $0x38] ss:$12 sps:$4 sm:$0xff]  }
  0x3b   :  { %219 = vmatprep.subr.bf16.mxu0 %v1414_v5  ;;  %1281 = vmatprep.subr.bf16.mxu1 %v1631_v0  ;;  %v1422_v11 = vld [vmem:[#allocation5 + $0x4c] ss:$12 sps:$4 sm:$0xff]   ;;  %v1424_v12 = vld [vmem:[#allocation5 + $0x48] ss:$12 sps:$4 sm:$0xff]   ;;  %v1425_v13 = vld [vmem:[#allocation5 + $0x50] ss:$12 sps:$4 sm:$0xff]  }
  0x3c   :  { %v1426_v14 = vld [vmem:[#allocation5 + $0x64] ss:$12 sps:$4 sm:$0xff]   ;;  %v1428_v15 = vld [vmem:[#allocation5 + $0x60] ss:$12 sps:$4 sm:$0xff]   ;;  %v1429_v16 = vld [vmem:[#allocation5 + $0x68] ss:$12 sps:$4 sm:$0xff]  }
  0x3d   :  { %v1430_v17 = vld [vmem:[#allocation5 + $0x7c] ss:$12 sps:$4 sm:$0xff]   ;;  %v1432_v18 = vld [vmem:[#allocation5 + $0x78] ss:$12 sps:$4 sm:$0xff]   ;;  %v1433_v19 = vld [vmem:[#allocation5 + $0x80] ss:$12 sps:$4 sm:$0xff]  }
  0x3e   :  { %220 = vmatpush1.bf16.msra.mxu0 %v1416_v6  ;;  %1282 = vmatpush3.bf16.msra.mxu1 %v1417_v7  ;;  %v1434_v20 = vld [vmem:[#allocation5 + $0x94] ss:$12 sps:$4 sm:$0xff]   ;;  %v1436_v21 = vld [vmem:[#allocation5 + $0x90] ss:$12 sps:$4 sm:$0xff]   ;;  %v1437_v22 = vld [vmem:[#allocation5 + $0x98] ss:$12 sps:$4 sm:$0xff]  }
  0x3f   :  { %221 = vmatprep.subr.bf16.mxu0 %v1418_v8  ;;  %1283 = vmatprep.subr.bf16.mxu1 %v1631_v0  ;;  %v1438_v23 = vld [vmem:[#allocation5 + $0xac] ss:$12 sps:$4 sm:$0xff]   ;;  %v1440_v24 = vld [vmem:[#allocation5 + $0xa8] ss:$12 sps:$4 sm:$0xff]   ;;  %v1441_v25 = vld [vmem:[#allocation5 + $0xb0] ss:$12 sps:$4 sm:$0xff]  }
  0x40   :  { %v1444_v27 = vld [vmem:[#allocation5 + $0xc4] ss:$12 sps:$4 sm:$0xff]   ;;  %v1442_v29 = vld [vmem:[#allocation5 + $0xc0] ss:$12 sps:$4 sm:$0xff]   ;;  %v1445_v30 = vld [vmem:[#allocation5 + $0xc8] ss:$12 sps:$4 sm:$0xff]  }
  0x41   :  { %v1448_v31 = vld [vmem:[#allocation5 + $0xdc] ss:$12 sps:$4 sm:$0xff]   ;;  %v1446_v32 = vld [vmem:[#allocation5 + $0xd8] ss:$12 sps:$4 sm:$0xff]   ;;  %v1449_v33 = vld [vmem:[#allocation5 + $0xe0] ss:$12 sps:$4 sm:$0xff]  }
  0x42   :  { %222 = vmatpush1.bf16.msra.mxu0 %v1420_v9  ;;  %1284 = vmatpush3.bf16.msra.mxu1 %v1421_v10  ;;  %v1452_v34 = vld [vmem:[#allocation5 + $0xf4] ss:$12 sps:$4 sm:$0xff]   ;;  %v1450_v35 = vld [vmem:[#allocation5 + $0xf0] ss:$12 sps:$4 sm:$0xff]   ;;  %v1453_v36 = vld [vmem:[#allocation5 + $0xf8] ss:$12 sps:$4 sm:$0xff]  }
  0x43   :  { %223 = vmatprep.subr.bf16.mxu0 %v1422_v11  ;;  %1285 = vmatprep.subr.bf16.mxu1 %v1631_v0  ;;  %v1456_v37 = vld [vmem:[#allocation5 + $0x10c] ss:$12 sps:$4 sm:$0xff]   ;;  %v1454_v38 = vld [vmem:[#allocation5 + $0x108] ss:$12 sps:$4 sm:$0xff]   ;;  %v1457_v39 = vld [vmem:[#allocation5 + $0x110] ss:$12 sps:$4 sm:$0xff]  }
  0x44   :  { %v1460_v40 = vld [vmem:[#allocation5 + $0x124] ss:$12 sps:$4 sm:$0xff]   ;;  %v1458_v41 = vld [vmem:[#allocation5 + $0x120] ss:$12 sps:$4 sm:$0xff]   ;;  %v1461_v42 = vld [vmem:[#allocation5 + $0x128] ss:$12 sps:$4 sm:$0xff]  }
  0x45   :  { %v1464_v43 = vld [vmem:[#allocation5 + $0x13c] ss:$12 sps:$4 sm:$0xff]   ;;  %v1462_v44 = vld [vmem:[#allocation5 + $0x138] ss:$12 sps:$4 sm:$0xff]   ;;  %v1465_v45 = vld [vmem:[#allocation5 + $0x140] ss:$12 sps:$4 sm:$0xff]  }
  0x46   :  { %224 = vmatpush1.bf16.msra.mxu0 %v1424_v12  ;;  %1286 = vmatpush3.bf16.msra.mxu1 %v1425_v13  ;;  %v1468_v46 = vld [vmem:[#allocation5 + $0x154] ss:$12 sps:$4 sm:$0xff]   ;;  %v1466_v47 = vld [vmem:[#allocation5 + $0x150] ss:$12 sps:$4 sm:$0xff]   ;;  %v1469_v48 = vld [vmem:[#allocation5 + $0x158] ss:$12 sps:$4 sm:$0xff]  }
  0x47   :  { %225 = vmatprep.subr.bf16.mxu0 %v1426_v14  ;;  %1287 = vmatprep.subr.bf16.mxu1 %v1631_v0  ;;  %v1472_v49 = vld [vmem:[#allocation5 + $0x16c] ss:$12 sps:$4 sm:$0xff]   ;;  %v1470_v50 = vld [vmem:[#allocation5 + $0x168] ss:$12 sps:$4 sm:$0xff]   ;;  %v1473_v51 = vld [vmem:[#allocation5 + $0x170] ss:$12 sps:$4 sm:$0xff]  }
  0x48   :  { %v1476_v52 = vld [vmem:[#allocation5 + $0x184] ss:$12 sps:$4 sm:$0xff]   ;;  %v1474_v2 = vld [vmem:[#allocation5 + $0x180] ss:$12 sps:$4 sm:$0xff]   ;;  %v1477_v3 = vld [vmem:[#allocation5 + $0x188] ss:$12 sps:$4 sm:$0xff]  }
  0x49   :  { %v1480_v5 = vld [vmem:[#allocation5 + $0x19c] ss:$12 sps:$4 sm:$0xff]   ;;  %v1478_v6 = vld [vmem:[#allocation5 + $0x198] ss:$12 sps:$4 sm:$0xff]   ;;  %v1481_v7 = vld [vmem:[#allocation5 + $0x1a0] ss:$12 sps:$4 sm:$0xff]  }
  0x4a   :  { %226 = vmatpush1.bf16.msra.mxu0 %v1428_v15  ;;  %1288 = vmatpush3.bf16.msra.mxu1 %v1429_v16  ;;  %v1484_v8 = vld [vmem:[#allocation5 + $0x1b4] ss:$12 sps:$4 sm:$0xff]   ;;  %v1482_v9 = vld [vmem:[#allocation5 + $0x1b0] ss:$12 sps:$4 sm:$0xff]   ;;  %v1485_v10 = vld [vmem:[#allocation5 + $0x1b8] ss:$12 sps:$4 sm:$0xff]  }
  0x4b   :  { %227 = vmatprep.subr.bf16.mxu0 %v1430_v17  ;;  %1289 = vmatprep.subr.bf16.mxu1 %v1631_v0  ;;  %v1488_v11 = vld [vmem:[#allocation5 + $0x1cc] ss:$12 sps:$4 sm:$0xff]   ;;  %v1486_v12 = vld [vmem:[#allocation5 + $0x1c8] ss:$12 sps:$4 sm:$0xff]   ;;  %v1489_v13 = vld [vmem:[#allocation5 + $0x1d0] ss:$12 sps:$4 sm:$0xff]  }
  0x4c   :  { %v1492_v14 = vld [vmem:[#allocation5 + $0x1e4] ss:$12 sps:$4 sm:$0xff]   ;;  %v1493_v15 = vld [vmem:[#allocation5 + $0x1e8] ss:$12 sps:$4 sm:$0xff]   ;;  %s1634_s2 = smov [#allocation8]  }
  0x4d   :  { %v1496_v16 = vld [vmem:[#allocation5 + $0x1fc] ss:$12 sps:$4 sm:$0xff]   ;;  %v1494_v17 = vld [vmem:[#allocation5 + $0x1f8] ss:$12 sps:$4 sm:$0xff]   ;;  %s1119_s23 = sshll.u32 %s1634_s2, 4  ;;  %s1120_s23 = int_to_ptr.vmem [resolvable:$true] %s1119_s23 }
  0x4e   :  { %228 = vmatpush1.bf16.msra.mxu0 %v1432_v18  ;;  %1290 = vmatpush3.bf16.msra.mxu1 %v1433_v19  ;;  %v1497_v18 = vld [vmem:[#allocation5 + $0x200] ss:$12 sps:$4 sm:$0xff]   ;;  %s1596_s24 = scalar_lea.vmem %s1120_s23, 128  ;;  %p1601_p11 = scmp.lt.s32.totalorder %s1120_s23, %s1120_s23 }
  0x4f   :  { %229 = vmatprep.subr.bf16.mxu0 %v1434_v20  ;;  %1291 = vmatprep.subr.bf16.mxu1 %v1631_v0  ;;  %v1500_v19 = vld [vmem:[#allocation5 + $0x214] ss:$12 sps:$4 sm:$0xff]   ;;  %v1498_v20 = vld [vmem:[#allocation5 + $0x210] ss:$12 sps:$4 sm:$0xff]   ;;  %p1597_p10 = scmp.ne.s32.totalorder %s1120_s23, %s1596_s24  ;;  %p1602_p12 = scmp.lt.s32.totalorder %s1596_s24, %s1596_s24 }
  0x51   :  { %p1603_p13 = por %p1602_p12, %p1601_p11 }
  0x52   :  { %230 = vmatpush1.bf16.msra.mxu0 %v1436_v21  ;;  %1292 = vmatpush3.bf16.msra.mxu1 %v1437_v22  ;;  %v1501_v21 = vld [vmem:[#allocation5 + $0x218] ss:$12 sps:$4 sm:$0xff]  }
  0x53   :  { %231 = vmatprep.subr.bf16.mxu0 %v1438_v23  ;;  %1293 = vmatprep.subr.bf16.mxu1 %v1631_v0  ;;  %v1504_v22 = vld [vmem:[#allocation5 + $0x22c] ss:$12 sps:$4 sm:$0xff]   ;;  %v1502_v23 = vld [vmem:[#allocation5 + $0x228] ss:$12 sps:$4 sm:$0xff]   ;;  %p1604_p0 = pnand %p1603_p13, %p1597_p10 }
  0x56   :  { %232 = vmatpush1.bf16.msra.mxu0 %v1440_v24  ;;  %1294 = vmatpush3.bf16.msra.mxu1 %v1441_v25  ;;  %v1505_v24 = vld [vmem:[#allocation5 + $0x230] ss:$12 sps:$4 sm:$0xff]  }
  0x57   :  { %463 = vmatprep.subr.bf16.mxu0 %v1444_v27  ;;  %1299 = vmatprep.subr.bf16.mxu1 %v1631_v0 }
  0x59   :  { %250 = vmatmul.mubr.bf16.vlgmr.msra.gmra.mrb[0].mxu0 %v88_v28  ;;  %1296 = vmatmul.mubr.bf16.vlgmr.msra.gmra.mrb[0].mxu1 %v88_v28 }
  0x5a   :  { %464 = vmatpush1.bf16.msra.mxu0 %v1442_v29  ;;  %1300 = vmatpush3.bf16.msra.mxu1 %v1445_v30 }
  0x5b   :  { %465 = vmatprep.subr.bf16.mxu0 %v1448_v31  ;;  %1301 = vmatprep.subr.bf16.mxu1 %v1631_v0 }
  0x5c   :  { %495 = vmatprep.mubr.bf16.mxu0 %v1632_v1  ;;  %1315 = vmatprep.mubr.msk.bf16.mxu1 %vm1633_vm0, %v1631_v0 }
  0x5e   :  { %466 = vmatpush1.bf16.msra.mxu0 %v1446_v32  ;;  %1302 = vmatpush3.bf16.msra.mxu1 %v1449_v33 }
  0x5f   :  { %467 = vmatprep.subr.bf16.mxu0 %v1452_v34  ;;  %1303 = vmatprep.subr.bf16.mxu1 %v1631_v0 }
  0x62   :  { %468 = vmatpush1.bf16.msra.mxu0 %v1450_v35  ;;  %1304 = vmatpush3.bf16.msra.mxu1 %v1453_v36  ;;  %v1506_v36 = vld [vmem:[#allocation7] sm:$0xff]  }
  0x63   :  { %469 = vmatprep.subr.bf16.mxu0 %v1456_v37  ;;  %1305 = vmatprep.subr.bf16.mxu1 %v1631_v0 }
  0x66   :  { %470 = vmatpush1.bf16.msra.mxu0 %v1454_v38  ;;  %1306 = vmatpush3.bf16.msra.mxu1 %v1457_v39  ;;  %v1507_v38 = vld [vmem:[#allocation7 + $0x8] sm:$0xff]   ;;  %v1508_v39 = vld [vmem:[#allocation7 + $0x10] sm:$0xff]  }
  0x67   :  { %471 = vmatprep.subr.bf16.mxu0 %v1460_v40  ;;  %1307 = vmatprep.subr.bf16.mxu1 %v1631_v0  ;;  %v1509_v40 = vld [vmem:[#allocation7 + $0x18] sm:$0xff]  }
  0x6a   :  { %472 = vmatpush1.bf16.msra.mxu0 %v1458_v41  ;;  %1308 = vmatpush3.bf16.msra.mxu1 %v1461_v42  ;;  %v1510_v41 = vld [vmem:[#allocation7 + $0x20] sm:$0xff]   ;;  %v1511_v42 = vld [vmem:[#allocation7 + $0x28] sm:$0xff]  }
  0x6b   :  { %473 = vmatprep.subr.bf16.mxu0 %v1464_v43  ;;  %1309 = vmatprep.subr.bf16.mxu1 %v1631_v0  ;;  %v1512_v43 = vld [vmem:[#allocation7 + $0x30] sm:$0xff]  }
  0x6e   :  { %474 = vmatpush1.bf16.msra.mxu0 %v1462_v44  ;;  %1310 = vmatpush3.bf16.msra.mxu1 %v1465_v45  ;;  %v1513_v44 = vld [vmem:[#allocation7 + $0x38] sm:$0xff]   ;;  %v1514_v45 = vld [vmem:[#allocation7 + $0x40] sm:$0xff]  }
  0x6f   :  { %1311 = vmatprep.subr.bf16.mxu1 %v1631_v0  ;;  %475 = vmatprep.subr.bf16.mxu0 %v1468_v46  ;;  %v1515_v46 = vld [vmem:[#allocation7 + $0x48] sm:$0xff]  }
  0x72   :  { %476 = vmatpush1.bf16.msra.mxu0 %v1466_v47  ;;  %1312 = vmatpush3.bf16.msra.mxu1 %v1469_v48  ;;  %v1516_v47 = vld [vmem:[#allocation7 + $0x50] sm:$0xff]   ;;  %v1517_v48 = vld [vmem:[#allocation7 + $0x58] sm:$0xff]  }
  0x73   :  { %1313 = vmatprep.subr.bf16.mxu1 %v1631_v0  ;;  %477 = vmatprep.subr.bf16.mxu0 %v1472_v49  ;;  %v1518_v49 = vld [vmem:[#allocation7 + $0x60] sm:$0xff]  }
  0x76   :  { %478 = vmatpush1.bf16.msra.mxu0 %v1470_v50  ;;  %1314 = vmatpush3.bf16.msra.mxu1 %v1473_v51  ;;  %v1519_v50 = vld [vmem:[#allocation7 + $0x68] sm:$0xff]   ;;  %v1520_v51 = vld [vmem:[#allocation7 + $0x70] sm:$0xff]  }
  0x77   :  { %1319 = vmatprep.subr.bf16.mxu1 %v1631_v0  ;;  %709 = vmatprep.subr.bf16.mxu0 %v1476_v52 }
 0x12c   :  { %v251_v53 = vpop.f32.mrb[0].mxu0  ;;  %v292_v54 = vpop.f32.mrb[0].mxu1 }
 0x12d   :  { %v253_v55 = vpop.f32.mrb[1].mxu0  ;;  %v1297_v57 = vpop.f32.mrb[1].mxu1 }
 0x12e   :  { %v298_v56 = vmax.f32 %v251_v53, %v253_v55  ;;  %v255_v58 = vpop.f32.mrb[2].mxu0  ;;  %v295_v59 = vpop.f32.mrb[2].mxu1 }
 0x12f   :  { %v256_v60 = vpop.f32.mrb[3].mxu0  ;;  %v1298_v62 = vpop.f32.mrb[3].mxu1 }
 0x130   :  { %v299_v61 = vmax.f32 %v298_v56, %v292_v54 }
 0x132   :  { %v300_v63 = vmax.f32 %v299_v61, 0.0 }
 0x134   :  { %v334_v4 = vpack.c.bf16 %v300_v63, %v300_v63 }
 0x136   :  { %496 = vmatmul.mubr.bf16.vlgmr.msra.gmra.mrb[4].mxu0 %v334_v4  ;;  %1316 = vmatmul.mubr.bf16.vlgmr.msra.gmra.mrb[4].mxu1 %v334_v4  ;;  %v1523_v4 = vld [vmem:[#allocation7 + $0x88] sm:$0xff]  }
 0x137   :  { %710 = vmatpush1.bf16.msra.mxu0 %v1474_v2  ;;  %1320 = vmatpush3.bf16.msra.mxu1 %v1477_v3  ;;  %v1521_v2 = vld [vmem:[#allocation7 + $0x78] sm:$0xff]   ;;  %v1522_v3 = vld [vmem:[#allocation7 + $0x80] sm:$0xff]  }
 0x138   :  { %711 = vmatprep.subr.bf16.mxu0 %v1480_v5  ;;  %1321 = vmatprep.subr.bf16.mxu1 %v1631_v0  ;;  %v1524_v5 = vld [vmem:[#allocation7 + $0x90] sm:$0xff]  }
 0x139   :  { %741 = vmatprep.mubr.bf16.mxu0 %v1632_v1  ;;  %1335 = vmatprep.mubr.msk.bf16.mxu1 %vm1633_vm0, %v1631_v0  ;;  %v1490_v1 = vld [vmem:[#allocation5 + $0x1e0] ss:$12 sps:$4 sm:$0xff]  }
 0x13b   :  { %712 = vmatpush1.bf16.msra.mxu0 %v1478_v6  ;;  %1322 = vmatpush3.bf16.msra.mxu1 %v1481_v7  ;;  %v1525_v6 = vld [vmem:[#allocation7 + $0x98] sm:$0xff]   ;;  %v1526_v7 = vld [vmem:[#allocation7 + $0xa0] sm:$0xff]  }
 0x13c   :  { %713 = vmatprep.subr.bf16.mxu0 %v1484_v8  ;;  %1323 = vmatprep.subr.bf16.mxu1 %v1631_v0  ;;  %v1527_v8 = vld [vmem:[#allocation7 + $0xa8] sm:$0xff]  }
 0x13f   :  { %714 = vmatpush1.bf16.msra.mxu0 %v1482_v9  ;;  %1324 = vmatpush3.bf16.msra.mxu1 %v1485_v10  ;;  %v1528_v9 = vld [vmem:[#allocation7 + $0xb0] sm:$0xff]  }
 0x140   :  { %715 = vmatprep.subr.bf16.mxu0 %v1488_v11  ;;  %1325 = vmatprep.subr.bf16.mxu1 %v1631_v0 }
 0x143   :  { %716 = vmatpush1.bf16.msra.mxu0 %v1486_v12  ;;  %1326 = vmatpush3.bf16.msra.mxu1 %v1489_v13 }
 0x144   :  { %717 = vmatprep.subr.bf16.mxu0 %v1492_v14  ;;  %1327 = vmatprep.subr.bf16.mxu1 %v1631_v0 }
 0x147   :  { %718 = vmatpush1.bf16.msra.mxu0 %v1490_v1  ;;  %1328 = vmatpush3.bf16.msra.mxu1 %v1493_v15  ;;  %v1529_v15 = vld [vmem:[#allocation7 + $0xb8] sm:$0xff]  }
 0x148   :  { %719 = vmatprep.subr.bf16.mxu0 %v1496_v16  ;;  %1329 = vmatprep.subr.bf16.mxu1 %v1631_v0 }
 0x14b   :  { %720 = vmatpush1.bf16.msra.mxu0 %v1494_v17  ;;  %1330 = vmatpush3.bf16.msra.mxu1 %v1497_v18 }
 0x14c   :  { %1331 = vmatprep.subr.bf16.mxu1 %v1631_v0  ;;  %721 = vmatprep.subr.bf16.mxu0 %v1500_v19 }
 0x14f   :  { %722 = vmatpush1.bf16.msra.mxu0 %v1498_v20  ;;  %1332 = vmatpush3.bf16.msra.mxu1 %v1501_v21 }
 0x150   :  { %1333 = vmatprep.subr.bf16.mxu1 %v1631_v0  ;;  %723 = vmatprep.subr.bf16.mxu0 %v1504_v22 }
 0x153   :  { %724 = vmatpush1.bf16.msra.mxu0 %v1502_v23  ;;  %1334 = vmatpush3.bf16.msra.mxu1 %v1505_v24 }
 0x154   :  { %1339 = vmatprep.subr.bf16.mxu0 %v1631_v0  ;;  %1359 = vmatprep.subr.bf16.mxu1 %v1631_v0 }
 0x209   :  { %v497_v25 = vpop.f32.mrb[4].mxu0  ;;  %v538_v26 = vpop.f32.mrb[4].mxu1 }
 0x20a   :  { %v499_v27 = vpop.f32.mrb[5].mxu0  ;;  %v1317_v28 = vpop.f32.mrb[5].mxu1 }
 0x20b   :  { %v544_v29 = vmax.f32 %v497_v25, %v499_v27  ;;  %v501_v30 = vpop.f32.mrb[6].mxu0  ;;  %v541_v31 = vpop.f32.mrb[6].mxu1 }
 0x20c   :  { %v502_v32 = vpop.f32.mrb[7].mxu0  ;;  %v1318_v33 = vpop.f32.mrb[7].mxu1 }
 0x20d   :  { %v545_v34 = vmax.f32 %v544_v29, %v538_v26 }
 0x20f   :  { %v546_v35 = vmax.f32 %v545_v34, 0.0 }
 0x211   :  { %v580_v37 = vpack.c.bf16 %v546_v35, %v546_v35 }
 0x213   :  { %742 = vmatmul.mubr.bf16.vlgmr.msra.gmra.mrb[8].mxu0 %v580_v37  ;;  %1336 = vmatmul.mubr.bf16.vlgmr.msra.gmra.mrb[8].mxu1 %v580_v37 }
 0x214   :  { %1340 = vmatpush3.bf16.msra.mxu0 %v1506_v36  ;;  %1355 = vmatprep.mubr.msk.bf16.mxu0 %vm1633_vm0, %v1631_v0 }
 0x215   :  { %1341 = vmatprep.subr.bf16.mxu0 %v1631_v0  ;;  %1375 = vmatprep.mubr.msk.bf16.mxu1 %vm1633_vm0, %v1631_v0 }
 0x216   :  { %1360 = vmatpush3.bf16.msra.mxu1 %v1514_v45 }
 0x217   :  { %1361 = vmatprep.subr.bf16.mxu1 %v1631_v0 }
 0x218   :  { %1342 = vmatpush3.bf16.msra.mxu0 %v1507_v38 }
 0x219   :  { %1343 = vmatprep.subr.bf16.mxu0 %v1631_v0 }
 0x21a   :  { %1362 = vmatpush3.bf16.msra.mxu1 %v1515_v46 }
 0x21b   :  { %1363 = vmatprep.subr.bf16.mxu1 %v1631_v0 }
 0x21c   :  { %1344 = vmatpush3.bf16.msra.mxu0 %v1508_v39 }
 0x21d   :  { %1345 = vmatprep.subr.bf16.mxu0 %v1631_v0 }
 0x21e   :  { %1364 = vmatpush3.bf16.msra.mxu1 %v1516_v47 }
 0x21f   :  { %1365 = vmatprep.subr.bf16.mxu1 %v1631_v0 }
 0x220   :  { %1346 = vmatpush3.bf16.msra.mxu0 %v1509_v40 }
 0x221   :  { %1347 = vmatprep.subr.bf16.mxu0 %v1631_v0 }
 0x222   :  { %1366 = vmatpush3.bf16.msra.mxu1 %v1517_v48 }
 0x223   :  { %1367 = vmatprep.subr.bf16.mxu1 %v1631_v0 }
 0x224   :  { %1348 = vmatpush3.bf16.msra.mxu0 %v1510_v41 }
 0x225   :  { %1349 = vmatprep.subr.bf16.mxu0 %v1631_v0 }
 0x226   :  { %1368 = vmatpush3.bf16.msra.mxu1 %v1518_v49 }
 0x227   :  { %1369 = vmatprep.subr.bf16.mxu1 %v1631_v0 }
 0x228   :  { %1350 = vmatpush3.bf16.msra.mxu0 %v1511_v42 }
 0x229   :  { %1351 = vmatprep.subr.bf16.mxu0 %v1631_v0 }
 0x22a   :  { %1370 = vmatpush3.bf16.msra.mxu1 %v1519_v50 }
 0x22b   :  { %1371 = vmatprep.subr.bf16.mxu1 %v1631_v0 }
 0x22c   :  { %1352 = vmatpush3.bf16.msra.mxu0 %v1512_v43 }
 0x22d   :  { %1353 = vmatprep.subr.bf16.mxu0 %v1631_v0 }
 0x22e   :  { %1372 = vmatpush3.bf16.msra.mxu1 %v1520_v51 }
 0x22f   :  { %1373 = vmatprep.subr.bf16.mxu1 %v1631_v0 }
 0x230   :  { %1354 = vmatpush3.bf16.msra.mxu0 %v1513_v44 }
 0x231   :  { %1379 = vmatprep.subr.bf16.mxu0 %v1631_v0 }
 0x232   :  { %1374 = vmatpush3.bf16.msra.mxu1 %v1521_v2 }
 0x2e6   :  { %v743_v52 = vpop.f32.mrb[8].mxu0  ;;  %v784_v53 = vpop.f32.mrb[8].mxu1 }
 0x2e7   :  { %v745_v54 = vpop.f32.mrb[9].mxu0  ;;  %v1337_v55 = vpop.f32.mrb[9].mxu1 }
 0x2e8   :  { %v790_v56 = vmax.f32 %v743_v52, %v745_v54  ;;  %v747_v57 = vpop.f32.mrb[10].mxu0  ;;  %v787_v58 = vpop.f32.mrb[10].mxu1 }
 0x2e9   :  { %v748_v59 = vpop.f32.mrb[11].mxu0  ;;  %v1338_v60 = vpop.f32.mrb[11].mxu1 }
 0x2ea   :  { %v791_v61 = vmax.f32 %v790_v56, %v784_v53 }
 0x2ec   :  { %v792_v62 = vmax.f32 %v791_v61, 0.0 }
 0x2ee   :  { %v809_v63 = vpack.c.bf16 %v792_v62, %v792_v62 }
 0x2f0   :  { %1356 = vmatmul.mubr.bf16.vlgmr.msra.gmra.mrb[12].mxu0 %v809_v63 }
 0x2f1   :  { %1395 = vmatprep.mubr.msk.bf16.mxu0 %vm1633_vm0, %v1631_v0  ;;  %1380 = vmatpush3.bf16.msra.mxu0 %v1522_v3 }
 0x2f2   :  { %1381 = vmatprep.subr.bf16.mxu0 %v1631_v0 }
 0x2f5   :  { %1382 = vmatpush3.bf16.msra.mxu0 %v1523_v4 }
 0x2f6   :  { %1383 = vmatprep.subr.bf16.mxu0 %v1631_v0 }
 0x2f9   :  { %1384 = vmatpush3.bf16.msra.mxu0 %v1524_v5 }
 0x2fa   :  { %1385 = vmatprep.subr.bf16.mxu0 %v1631_v0 }
 0x2fd   :  { %1386 = vmatpush3.bf16.msra.mxu0 %v1525_v6 }
 0x2fe   :  { %1387 = vmatprep.subr.bf16.mxu0 %v1631_v0 }
 0x301   :  { %1388 = vmatpush3.bf16.msra.mxu0 %v1526_v7 }
 0x302   :  { %1389 = vmatprep.subr.bf16.mxu0 %v1631_v0 }
 0x305   :  { %1390 = vmatpush3.bf16.msra.mxu0 %v1527_v8 }
 0x306   :  { %1391 = vmatprep.subr.bf16.mxu0 %v1631_v0 }
 0x309   :  { %1392 = vmatpush3.bf16.msra.mxu0 %v1528_v9 }
 0x30a   :  { %1393 = vmatprep.subr.bf16.mxu0 %v1631_v0 }
 0x30d   :  { %1394 = vmatpush3.bf16.msra.mxu0 %v1529_v15 }
 0x3c3   :  { %v892_v10 = vpop.f32.mrb[12].mxu0 }
 0x3c4   :  { %v898_v11 = vmax.f32 %v892_v10, 0.0  ;;  %v1357_v12 = vpop.f32.mrb[13].mxu0 }
 0x3c5   :  { %v895_v13 = vpop.f32.mrb[14].mxu0 }
 0x3c6   :  { %v916_v14 = vpack.c.bf16 %v898_v11, %v898_v11  ;;  %v1358_v1 = vpop.f32.mrb[15].mxu0 }
 0x3c8   :  { %1376 = vmatmul.mubr.bf16.vlgmr.msra.gmra.mrb[12].mxu1 %v916_v14 }
 0x49b   :  { %v999_v16 = vpop.f32.mrb[12].mxu1 }
 0x49c   :  { %v1005_v17 = vmax.f32 %v999_v16, 0.0  ;;  %v1377_v18 = vpop.f32.mrb[13].mxu1 }
 0x49d   :  { %v1002_v19 = vpop.f32.mrb[14].mxu1 }
 0x49e   :  { %v1023_v20 = vpack.c.bf16 %v1005_v17, %v1005_v17  ;;  %v1378_v21 = vpop.f32.mrb[15].mxu1 }
 0x4a0   :  { %1396 = vmatmul.mubr.bf16.vlgmr.msra.gmra.mrb[16].mxu0 %v1023_v20 }
 0x573   :  { %v1106_v0 = vpop.f32.mrb[16].mxu0 }
 0x574   :  { %1112 = vst [vmem:[#allocation8] sm:$0xff] %v1106_v0  ;;  %v1397_v22 = vpop.f32.mrb[17].mxu0 }
 0x575   :  { %v1109_v23 = vpop.f32.mrb[18].mxu0 }
 0x576   :  { %1607 = shalt.err (!%p1604_p0)
}
 0x577   :  { %s1608_s27 = scalar_lea.hbm %s1769_s3, 128 }
 0x578   :  { %p1609_p1 = scmp.ne.s32.totalorder %s1769_s3, %s1608_s27  ;;  %p1612_p2 = scmp.lt.u32.totalorder %s1608_s27, %s1769_s3 }
 0x57a   :  { %p1614_p3 = pnand %p1612_p2, %p1609_p1 }
 0x57c   :  { %1617 = shalt.err (!%p1614_p3)
}
 0x57d   :  { %1122 = dma.vmem_to_hbm [thread:$0]  %s1120_s23, 128, %s1769_s3, [#allocation4]   ;;  %v1398_v24 = vpop.f32.mrb[19].mxu0 }
 0x57e   :  { %1622 = dma.done.wait [#allocation4], 128  }
 0x57f   :  { %1623 = vsyncadd [#allocation4], 4294967168 }
 0x580   :  { %1126 = vsyncpa [#allocation3], 1 }
 0x581   :  { %1127 = vsyncpa [#allocation6], 1 }
 0x582   :  { %1128 = vsyncpa [#allocation4], 1 }

</bundles_post_ra>
